<compile_context>
chip_gen: v7x
topology: tpu7x:2x2x1
jax: 0.10.0
libtpu: 0.0.40
codegen_flags: <defaults>
</compile_context>

<pallas_src>
import functools

import jax
import jax.numpy as jnp
from jax.experimental import pallas as pl
from jax.experimental.pallas import tpu as pltpu

CHN_MID = 32
EPS = 0.1
SUB = 8                        # sublane rows used for the dense loss tail
MAX_TILE_M = 32768             # pixels per grid step (multiple of SUB*128 = 1024)
VMEM_LIMIT_BYTES = 48 * 1024 * 1024


def _cdiv(a, b):
    return -(-a // b)


def _round_up(x, k):
    return ((x + k - 1) // k) * k


def _default_num_splits():
    # 2 TensorCores only on v7x; on single-TC chips the split is a wasteful serial loop.
    try:
        kind = jax.devices()[0].device_kind.lower()
    except Exception:
        return 1
    return 2 if ("v7" in kind or "7x" in kind) else 1


def _bce_ranking_kernel(d0_ref, d1_ref, judge_ref, w1_ref, b1_ref, w2_ref, b2_ref,
                        w3_ref, b3_ref, out_ref, x8_ref, *,
                        tile_m, n_inner, total_valid, needs_mask):
    p = pl.program_id(0)           # parallel split (maps to TCs on v7x)
    i = pl.program_id(1)           # reduction step within the split
    cc = tile_m // SUB

    @pl.when(i == 0)
    def _():
        # Dense (8, 128) partial-sum accumulator lives directly in the output block.
        out_ref[...] = jnp.zeros_like(out_ref)
        # Feature rows 4..7 stay zero (W1 is also zero-padded to 8 input channels).
        x8_ref[4:8, :] = jnp.zeros((4, tile_m), jnp.float32)

    d0 = d0_ref[...]               # (1, tile_m)
    d1 = d1_ref[...]               # (1, tile_m)
    d = jnp.concatenate([d0, d1], axis=0)        # (2, tile_m): [d0; d1]
    dsw = jnp.concatenate([d1, d0], axis=0)      # (2, tile_m): [d1; d0]

    # Feature stack (rows 0-3 live, 4-7 zero).  Both ratios in ONE divide.
    # TODO(synk): pl.reciprocal(..., approx=True)*d would cut EUP cost further but
    # was not adopted to stay safely within the 1e-4 reference tolerance.
    x8_ref[0:2, :] = d
    x8_ref[2:4, :] = d / (dsw + EPS)             # [d0/(d1+e); d1/(d0+e)]
    x = x8_ref[...]                              # (8, tile_m)

    # 1x1 conv #1: 4 features (d0-d1 folded into W1, padded to 8) -> 32, LeakyReLU(0.2)
    h = jnp.dot(w1_ref[...], x, preferred_element_type=jnp.float32) + b1_ref[...]
    h = jnp.maximum(h, 0.2 * h)
    # 1x1 conv #2: 32 -> 32, LeakyReLU(0.2)
    h = jnp.dot(w2_ref[...], h, preferred_element_type=jnp.float32) + b2_ref[...]
    h = jnp.maximum(h, 0.2 * h)
    # 1x1 conv #3: 32 -> 1 (logit)
    z = jnp.dot(w3_ref[...], h, preferred_element_type=jnp.float32) + b3_ref[...]  # (1, tile_m)

    # Sublane-dense (SUB, cc) re-pack of the logit: single reshape (relayout rides
    # XLU/ld-st slots which have slack; exp/log stay on densely packed vregs).
    z2 = z.reshape(SUB, cc)

    # judge arrives pre-laid-out in the matching dense layout.
    per = (judge_ref[...] + 1.0) * 0.5            # (SUB, cc)

    # BCE with logits, reproducing PyTorch BCELoss' log clamp at -100:
    #   -clamp(log(sigmoid(z)),   min=-100) = min(softplus(-z), 100)
    #   -clamp(log(1-sigmoid(z)), min=-100) = min(softplus( z), 100)
    e = jnp.exp(-jnp.abs(z2))
    log_term = jnp.log(1.0 + e)
    sp_pos = jnp.maximum(z2, 0.0) + log_term      # softplus(z)
    sp_neg = sp_pos - z2                          # softplus(-z)
    bce = per * jnp.minimum(sp_neg, 100.0) + (1.0 - per) * jnp.minimum(sp_pos, 100.0)

    if needs_mask:
        # Loop-invariant local index vs. traced per-tile valid-count threshold.
        thresh = total_valid - (p * n_inner + i) * tile_m
        local = (jax.lax.broadcasted_iota(jnp.int32, (SUB, cc), 0) * cc
                 + jax.lax.broadcasted_iota(jnp.int32, (SUB, cc), 1))
        bce = jnp.where(local < thresh, bce, 0.0)

    # Dense lane-chunk accumulation into the resident (8, 128) output block:
    # only VPU adds on the loop-carried path (no per-step XLU reduce).
    n_chunks = cc // 128
    partial = bce[:, 0:128]
    for k in range(1, n_chunks):
        partial = partial + bce[:, k * 128:(k + 1) * 128]
    out_ref[...] += partial


def bce_ranking_loss(d0, d1, judge, params, *,
                     max_tile_m=MAX_TILE_M, num_splits=None):
    """d0, d1, judge: (N, 1, H, W) float32. Returns scalar loss (float32)."""
    n, c, h, w = d0.shape
    assert c == 1
    m = n * h * w
    if num_splits is None:
        num_splits = _default_num_splits()

    # Tile size: as large as possible (fewer grid steps, bigger DMAs), capped so
    # the (32, tile_m) fp32 intermediates stay inside every generation's VMEM
    # (v7x has only 64 MiB physical per TC). Multiple of SUB * 128 = 1024.
    tile_m = min(max_tile_m, _round_up(_cdiv(m, num_splits), SUB * 128))
    padded_m = _round_up(m, num_splits * tile_m)
    n_inner = padded_m // (num_splits * tile_m)
    cc = tile_m // SUB
    pad = padded_m - m

    d0_f = d0.reshape(1, m).astype(jnp.float32)
    d1_f = d1.reshape(1, m).astype(jnp.float32)
    j_f = judge.reshape(m).astype(jnp.float32)
    if pad:
        d0_f = jnp.pad(d0_f, ((0, 0), (0, pad)), constant_values=1.0)
        d1_f = jnp.pad(d1_f, ((0, 0), (0, pad)), constant_values=1.0)
        j_f = jnp.pad(j_f, (0, pad))
    # judge pre-laid-out sublane-dense: tile t == rows [t*SUB, (t+1)*SUB).
    j_dense = j_f.reshape(padded_m // cc, cc)

    w1, b1, w2, b2, w3, b3 = params
    # Fold the (d0 - d1) feature into W1 (exact, host-side, zero runtime cost):
    # features become [d0, d1, d0/(d1+e), d1/(d0+e)], zero-padded to 8 channels.
    w1_eff = jnp.stack([w1[:, 0] + w1[:, 2],
                        w1[:, 1] - w1[:, 2],
                        w1[:, 3],
                        w1[:, 4]], axis=1)                       # (chn_mid, 4)
    w1p = jnp.pad(w1_eff, ((0, 0), (0, 8 - w1_eff.shape[1])))    # (chn_mid, 8)

    kernel = functools.partial(
        _bce_ranking_kernel, tile_m=tile_m, n_inner=n_inner,
        total_valid=m, needs_mask=(pad != 0))

    full = lambda a: pl.BlockSpec(a.shape, lambda p, i: (0, 0))

    out = pl.pallas_call(
        kernel,
        out_shape=jax.ShapeDtypeStruct((num_splits * SUB, 128), jnp.float32),
        grid_spec=pltpu.PrefetchScalarGridSpec(
            num_scalar_prefetch=0,
            grid=(num_splits, n_inner),
            in_specs=[
                pl.BlockSpec((1, tile_m), lambda p, i: (0, p * n_inner + i)),
                pl.BlockSpec((1, tile_m), lambda p, i: (0, p * n_inner + i)),
                pl.BlockSpec((SUB, cc), lambda p, i: (p * n_inner + i, 0)),
                full(w1p), full(b1), full(w2), full(b2), full(w3), full(b3),
            ],
            out_specs=pl.BlockSpec((SUB, 128), lambda p, i: (p, 0)),
            scratch_shapes=[pltpu.VMEM((SUB, tile_m), jnp.float32)],
        ),
        compiler_params=pltpu.CompilerParams(
            dimension_semantics=("parallel", "arbitrary"),
            vmem_limit_bytes=VMEM_LIMIT_BYTES),
    )(d0_f, d1_f, j_dense, w1p, b1, w2, b2, w3, b3)

    return jnp.sum(out) / jnp.float32(m)


def init_params(key, chn_mid=CHN_MID):
    """Deterministic synthetic init matching nn.Conv2d(..., kernel_size=1) shapes."""
    k1, k2, k3, k4, k5, k6 = jax.random.split(key, 6)
    w1 = jax.random.uniform(k1, (chn_mid, 5), jnp.float32, -0.4, 0.4)
    b1 = jax.random.uniform(k2, (chn_mid, 1), jnp.float32, -0.4, 0.4)
    w2 = jax.random.uniform(k3, (chn_mid, chn_mid), jnp.float32, -0.17, 0.17)
    b2 = jax.random.uniform(k4, (chn_mid, 1), jnp.float32, -0.17, 0.17)
    w3 = jax.random.uniform(k5, (1, chn_mid), jnp.float32, -0.17, 0.17)
    b3 = jax.random.uniform(k6, (1, 1), jnp.float32, -0.17, 0.17)
    return (w1, b1, w2, b2, w3, b3)


def _reference(d0, d1, judge, params):
    """Pure-JAX reference matching the PyTorch module exactly."""
    w1, b1, w2, b2, w3, b3 = params
    m = d0.size
    x = jnp.concatenate(
        [d0.reshape(1, m), d1.reshape(1, m),
         (d0 - d1).reshape(1, m),
         (d0 / (d1 + EPS)).reshape(1, m),
         (d1 / (d0 + EPS)).reshape(1, m)], axis=0)
    h = w1 @ x + b1
    h = jnp.where(h >= 0, h, 0.2 * h)
    h = w2 @ h + b2
    h = jnp.where(h >= 0, h, 0.2 * h)
    p = jax.nn.sigmoid(w3 @ h + b3)
    per = (judge.reshape(1, m) + 1.0) * 0.5
    bce = -(per * jnp.maximum(jnp.log(p), -100.0)
            + (1.0 - per) * jnp.maximum(jnp.log(1.0 - p), -100.0))
    return jnp.mean(bce)


if __name__ == "__main__":
    key = jax.random.PRNGKey(0)
    kp, kd0, kd1, kj, kd0b, kd1b, kjb = jax.random.split(key, 7)

    params = init_params(kp)

    # Test 1: small LPIPS-ranking-like shapes (exercises the padded/masked path).
    N, H, W = 2, 16, 16
    d0 = jax.random.uniform(kd0, (N, 1, H, W), jnp.float32, 0.0, 1.0)
    d1 = jax.random.uniform(kd1, (N, 1, H, W), jnp.float32, 0.0, 1.0)
    judge = jax.random.uniform(kj, (N, 1, H, W), jnp.float32, -1.0, 1.0)

    loss = bce_ranking_loss(d0, d1, judge, params)
    jax.block_until_ready(loss)
    expected = _reference(d0, d1, judge, params)
    assert jnp.allclose(loss, expected, rtol=1e-4, atol=1e-5), (loss, expected)

    # Test 2: pixel count not a multiple of the tile (masked tail, multi-chunk cc).
    N2, H2, W2 = 3, 20, 20
    d0b = jax.random.uniform(kd0b, (N2, 1, H2, W2), jnp.float32, 0.0, 1.0)
    d1b = jax.random.uniform(kd1b, (N2, 1, H2, W2), jnp.float32, 0.0, 1.0)
    judgeb = jax.random.uniform(kjb, (N2, 1, H2, W2), jnp.float32, -1.0, 1.0)

    loss2 = bce_ranking_loss(d0b, d1b, judgeb, params)
    jax.block_until_ready(loss2)
    expected2 = _reference(d0b, d1b, judgeb, params)
    assert jnp.allclose(loss2, expected2, rtol=1e-4, atol=1e-5), (loss2, expected2)

    # TODO(synk): backward pass / autograd of BCERankingLoss is not implemented
    # (forward only, matching the requested forward-pass translation).
    print("KERNEL_OK")
</pallas_src>

<mosaic_0001>
module attributes {stable_mosaic.version = 11 : i64} {
  func.func @_bce_ranking_kernel(%arg0: i32, %arg1: i32, %arg2: memref<1x1024xf32, #tpu.memory_space<vmem>>, %arg3: memref<1x1024xf32, #tpu.memory_space<vmem>>, %arg4: memref<8x128xf32, #tpu.memory_space<vmem>>, %arg5: memref<32x8xf32, #tpu.memory_space<vmem>>, %arg6: memref<32x1xf32, #tpu.memory_space<vmem>>, %arg7: memref<32x32xf32, #tpu.memory_space<vmem>>, %arg8: memref<32x1xf32, #tpu.memory_space<vmem>>, %arg9: memref<1x32xf32, #tpu.memory_space<vmem>>, %arg10: memref<1x1xf32, #tpu.memory_space<vmem>>, %arg11: memref<8x128xf32, #tpu.memory_space<vmem>>, %arg12: memref<8x1024xf32, #tpu.memory_space<vmem>>) attributes {dimension_semantics = [#tpu.dimension_semantics<parallel>, #tpu.dimension_semantics<arbitrary>], iteration_bounds = array<i64: 1, 1>, scalar_prefetch = 0 : i64, scratch_operands = 1 : i64, tpu.core_type = #tpu.core_type<tc>, window_params = [{transform_indices = @transform_0, window_bounds = array<i64: 1, 1024>}, {transform_indices = @transform_1, window_bounds = array<i64: 1, 1024>}, {transform_indices = @transform_2, window_bounds = array<i64: 8, 128>}, {pipeline_mode = #tpu.pipeline_mode<synchronous>, transform_indices = @transform_3, window_bounds = array<i64: 32, 8>}, {pipeline_mode = #tpu.pipeline_mode<synchronous>, transform_indices = @transform_4, window_bounds = array<i64: 32, 1>}, {pipeline_mode = #tpu.pipeline_mode<synchronous>, transform_indices = @transform_5, window_bounds = array<i64: 32, 32>}, {pipeline_mode = #tpu.pipeline_mode<synchronous>, transform_indices = @transform_6, window_bounds = array<i64: 32, 1>}, {pipeline_mode = #tpu.pipeline_mode<synchronous>, transform_indices = @transform_7, window_bounds = array<i64: 1, 32>}, {pipeline_mode = #tpu.pipeline_mode<synchronous>, transform_indices = @transform_8, window_bounds = array<i64: 1, 1>}, {transform_indices = @transform_9, window_bounds = array<i64: 8, 128>}]} {
    %c0_i32 = arith.constant 0 : i32
    %0 = arith.cmpi eq, %arg1, %c0_i32 : i32
    %1 = arith.extui %0 : i1 to i32
    %c0_i32_0 = arith.constant 0 : i32
    %2 = arith.cmpi ne, %1, %c0_i32_0 : i32
    scf.if %2 {
      %cst_41 = arith.constant 0.000000e+00 : f32
      %76 = vector.broadcast %cst_41 : f32 to vector<8x128xf32>
      %c0_42 = arith.constant 0 : index
      %c0_43 = arith.constant 0 : index
      %77 = vector.load %arg11[%c0_42, %c0_43] : memref<8x128xf32, #tpu.memory_space<vmem>>, vector<8x128xf32>
      tpu.vector_store %arg11[%c0_42, %c0_43], %76 {strides = array<i32>} : memref<8x128xf32, #tpu.memory_space<vmem>>, vector<8x128xf32>,
      %cst_44 = arith.constant 0.000000e+00 : f32
      %78 = vector.broadcast %cst_44 : f32 to vector<4x1024xf32>
      %c4 = arith.constant 4 : index
      %c0_45 = arith.constant 0 : index
      %79 = vector.load %arg12[%c4, %c0_45] : memref<8x1024xf32, #tpu.memory_space<vmem>>, vector<4x1024xf32>
      tpu.vector_store %arg12[%c4, %c0_45], %78 {strides = array<i32>} : memref<8x1024xf32, #tpu.memory_space<vmem>>, vector<4x1024xf32>,
    } else {
    }
    %c0 = arith.constant 0 : index
    %c0_1 = arith.constant 0 : index
    %3 = vector.load %arg2[%c0, %c0_1] : memref<1x1024xf32, #tpu.memory_space<vmem>>, vector<1x1024xf32>
    %c0_2 = arith.constant 0 : index
    %c0_3 = arith.constant 0 : index
    %4 = vector.load %arg3[%c0_2, %c0_3] : memref<1x1024xf32, #tpu.memory_space<vmem>>, vector<1x1024xf32>
    %5 = tpu.concatenate %3, %4 in 0 : vector<1x1024xf32>, vector<1x1024xf32> -> vector<2x1024xf32>
    %6 = tpu.concatenate %4, %3 in 0 : vector<1x1024xf32>, vector<1x1024xf32> -> vector<2x1024xf32>
    %c0_4 = arith.constant 0 : index
    %c0_5 = arith.constant 0 : index
    %7 = vector.load %arg12[%c0_4, %c0_5] : memref<8x1024xf32, #tpu.memory_space<vmem>>, vector<2x1024xf32>
    tpu.vector_store %arg12[%c0_4, %c0_5], %5 {strides = array<i32>} : memref<8x1024xf32, #tpu.memory_space<vmem>>, vector<2x1024xf32>,
    %cst = arith.constant 1.000000e-01 : f32
    %8 = vector.broadcast %cst : f32 to vector<2x1024xf32>
    %9 = arith.addf %6, %8 : vector<2x1024xf32>
    %10 = arith.divf %5, %9 : vector<2x1024xf32>
    %c2 = arith.constant 2 : index
    %c0_6 = arith.constant 0 : index
    %11 = vector.load %arg12[%c2, %c0_6] : memref<8x1024xf32, #tpu.memory_space<vmem>>, vector<2x1024xf32>
    tpu.vector_store %arg12[%c2, %c0_6], %10 {strides = array<i32>} : memref<8x1024xf32, #tpu.memory_space<vmem>>, vector<2x1024xf32>,
    %c0_7 = arith.constant 0 : index
    %c0_8 = arith.constant 0 : index
    %12 = vector.load %arg12[%c0_7, %c0_8] : memref<8x1024xf32, #tpu.memory_space<vmem>>, vector<8x1024xf32>
    %c0_9 = arith.constant 0 : index
    %c0_10 = arith.constant 0 : index
    %13 = vector.load %arg5[%c0_9, %c0_10] : memref<32x8xf32, #tpu.memory_space<vmem>>, vector<32x8xf32>
    %cst_11 = arith.constant dense<0.000000e+00> : vector<32x1024xf32>
    %14 = tpu.matmul %13, %12, %cst_11 {dimension_numbers = #tpu.dot_dimension_numbers<[1], [0], [0], [1], [0, 0, 1, 1], [], []>} : vector<32x8xf32>, vector<8x1024xf32>, vector<32x1024xf32> -> vector<32x1024xf32>
    %c0_12 = arith.constant 0 : index
    %c0_13 = arith.constant 0 : index
    %15 = vector.load %arg6[%c0_12, %c0_13] : memref<32x1xf32, #tpu.memory_space<vmem>>, vector<32x1xf32>
    %16 = vector.broadcast %15 : vector<32x1xf32> to vector<32x1024xf32>
    %17 = arith.addf %14, %16 : vector<32x1024xf32>
    %cst_14 = arith.constant 2.000000e-01 : f32
    %18 = vector.broadcast %cst_14 : f32 to vector<32x1024xf32>
    %19 = arith.mulf %18, %17 : vector<32x1024xf32>
    %20 = arith.maximumf %17, %19 : vector<32x1024xf32>
    %c0_15 = arith.constant 0 : index
    %c0_16 = arith.constant 0 : index
    %21 = vector.load %arg7[%c0_15, %c0_16] : memref<32x32xf32, #tpu.memory_space<vmem>>, vector<32x32xf32>
    %cst_17 = arith.constant dense<0.000000e+00> : vector<32x1024xf32>
    %22 = tpu.matmul %21, %20, %cst_17 {dimension_numbers = #tpu.dot_dimension_numbers<[1], [0], [0], [1], [0, 0, 1, 1], [], []>} : vector<32x32xf32>, vector<32x1024xf32>, vector<32x1024xf32> -> vector<32x1024xf32>
    %c0_18 = arith.constant 0 : index
    %c0_19 = arith.constant 0 : index
    %23 = vector.load %arg8[%c0_18, %c0_19] : memref<32x1xf32, #tpu.memory_space<vmem>>, vector<32x1xf32>
    %24 = vector.broadcast %23 : vector<32x1xf32> to vector<32x1024xf32>
    %25 = arith.addf %22, %24 : vector<32x1024xf32>
    %cst_20 = arith.constant 2.000000e-01 : f32
    %26 = vector.broadcast %cst_20 : f32 to vector<32x1024xf32>
    %27 = arith.mulf %26, %25 : vector<32x1024xf32>
    %28 = arith.maximumf %25, %27 : vector<32x1024xf32>
    %c0_21 = arith.constant 0 : index
    %c0_22 = arith.constant 0 : index
    %29 = vector.load %arg9[%c0_21, %c0_22] : memref<1x32xf32, #tpu.memory_space<vmem>>, vector<1x32xf32>
    %cst_23 = arith.constant dense<0.000000e+00> : vector<1x1024xf32>
    %30 = tpu.matmul %29, %28, %cst_23 {dimension_numbers = #tpu.dot_dimension_numbers<[1], [0], [0], [1], [0, 0, 1, 1], [], []>} : vector<1x32xf32>, vector<32x1024xf32>, vector<1x1024xf32> -> vector<1x1024xf32>
    %c0_24 = arith.constant 0 : index
    %c0_25 = arith.constant 0 : index
    %31 = vector.load %arg10[%c0_24, %c0_25] : memref<1x1xf32, #tpu.memory_space<vmem>>, vector<1x1xf32>
    %32 = vector.broadcast %31 : vector<1x1xf32> to vector<1x1024xf32>
    %33 = arith.addf %30, %32 : vector<1x1024xf32>
    %34 = vector.shape_cast %33 : vector<1x1024xf32> to vector<8x128xf32>
    %c0_26 = arith.constant 0 : index
    %c0_27 = arith.constant 0 : index
    %35 = vector.load %arg4[%c0_26, %c0_27] : memref<8x128xf32, #tpu.memory_space<vmem>>, vector<8x128xf32>
    %cst_28 = arith.constant 1.000000e+00 : f32
    %36 = vector.broadcast %cst_28 : f32 to vector<8x128xf32>
    %37 = arith.addf %35, %36 : vector<8x128xf32>
    %cst_29 = arith.constant 5.000000e-01 : f32
    %38 = vector.broadcast %cst_29 : f32 to vector<8x128xf32>
    %39 = arith.mulf %37, %38 : vector<8x128xf32>
    %40 = math.absf %34 : vector<8x128xf32>
    %cst_30 = arith.constant 0.000000e+00 : f32
    %41 = vector.broadcast %cst_30 : f32 to vector<8x128xf32>
    %42 = arith.subf %41, %40 : vector<8x128xf32>
    %43 = math.exp %42 : vector<8x128xf32>
    %cst_31 = arith.constant 1.000000e+00 : f32
    %44 = vector.broadcast %cst_31 : f32 to vector<8x128xf32>
    %45 = arith.addf %44, %43 : vector<8x128xf32>
    %46 = math.log %45 : vector<8x128xf32>
    %cst_32 = arith.constant 0.000000e+00 : f32
    %47 = vector.broadcast %cst_32 : f32 to vector<8x128xf32>
    %48 = arith.maximumf %34, %47 : vector<8x128xf32>
    %49 = arith.addf %48, %46 : vector<8x128xf32>
    %50 = arith.subf %49, %34 : vector<8x128xf32>
    %cst_33 = arith.constant 1.000000e+02 : f32
    %51 = vector.broadcast %cst_33 : f32 to vector<8x128xf32>
    %52 = arith.minimumf %50, %51 : vector<8x128xf32>
    %53 = arith.mulf %39, %52 : vector<8x128xf32>
    %cst_34 = arith.constant 1.000000e+00 : f32
    %54 = vector.broadcast %cst_34 : f32 to vector<8x128xf32>
    %55 = arith.subf %54, %39 : vector<8x128xf32>
    %cst_35 = arith.constant 1.000000e+02 : f32
    %56 = vector.broadcast %cst_35 : f32 to vector<8x128xf32>
    %57 = arith.minimumf %49, %56 : vector<8x128xf32>
    %58 = arith.mulf %55, %57 : vector<8x128xf32>
    %59 = arith.addf %53, %58 : vector<8x128xf32>
    %c1_i32 = arith.constant 1 : i32
    %60 = arith.muli %arg0, %c1_i32 : i32
    %61 = arith.addi %60, %arg1 : i32
    %c1024_i32 = arith.constant 1024 : i32
    %62 = arith.muli %61, %c1024_i32 : i32
    %c512_i32 = arith.constant 512 : i32
    %63 = arith.subi %c512_i32, %62 : i32
    %64 = tpu.iota {dimensions = array<i32: 0>} : vector<8x128xi32>
    %c128_i32 = arith.constant 128 : i32
    %65 = vector.broadcast %c128_i32 : i32 to vector<8x128xi32>
    %66 = arith.muli %64, %65 : vector<8x128xi32>
    %67 = tpu.iota {dimensions = array<i32: 1>} : vector<8x128xi32>
    %68 = arith.addi %66, %67 : vector<8x128xi32>
    %69 = vector.broadcast %63 : i32 to vector<8x128xi32>
    %70 = arith.cmpi slt, %68, %69 : vector<8x128xi32>
    %cst_36 = arith.constant 0.000000e+00 : f32
    %71 = vector.broadcast %cst_36 : f32 to vector<8x128xf32>
    %72 = arith.select %70, %59, %71 : vector<8x128xi1>, vector<8x128xf32>
    %c0_37 = arith.constant 0 : index
    %c0_38 = arith.constant 0 : index
    %73 = vector.load %arg11[%c0_37, %c0_38] : memref<8x128xf32, #tpu.memory_space<vmem>>, vector<8x128xf32>
    %74 = arith.addf %73, %72 : vector<8x128xf32>
    %c0_39 = arith.constant 0 : index
    %c0_40 = arith.constant 0 : index
    %75 = vector.load %arg11[%c0_39, %c0_40] : memref<8x128xf32, #tpu.memory_space<vmem>>, vector<8x128xf32>
    tpu.vector_store %arg11[%c0_39, %c0_40], %74 {strides = array<i32>} : memref<8x128xf32, #tpu.memory_space<vmem>>, vector<8x128xf32>,
    return
  }
  func.func @transform_0(%arg0: i32, %arg1: i32) -> (i32, i32) {
    %c1_i32 = arith.constant 1 : i32
    %0 = arith.muli %arg0, %c1_i32 : i32
    %1 = arith.addi %0, %arg1 : i32
    %c0_i32 = arith.constant 0 : i32
    %c0_i32_0 = arith.constant 0 : i32
    return %c0_i32, %1 : i32, i32
  }
  func.func @transform_1(%arg0: i32, %arg1: i32) -> (i32, i32) {
    %c1_i32 = arith.constant 1 : i32
    %0 = arith.muli %arg0, %c1_i32 : i32
    %1 = arith.addi %0, %arg1 : i32
    %c0_i32 = arith.constant 0 : i32
    %c0_i32_0 = arith.constant 0 : i32
    return %c0_i32, %1 : i32, i32
  }
  func.func @transform_2(%arg0: i32, %arg1: i32) -> (i32, i32) {
    %c1_i32 = arith.constant 1 : i32
    %0 = arith.muli %arg0, %c1_i32 : i32
    %1 = arith.addi %0, %arg1 : i32
    %c0_i32 = arith.constant 0 : i32
    %c0_i32_0 = arith.constant 0 : i32
    return %1, %c0_i32 : i32, i32
  }
  func.func @transform_3(%arg0: i32, %arg1: i32) -> (i32, i32) {
    %c0_i32 = arith.constant 0 : i32
    %c0_i32_0 = arith.constant 0 : i32
    %c0_i32_1 = arith.constant 0 : i32
    return %c0_i32, %c0_i32_0 : i32, i32
  }
  func.func @transform_4(%arg0: i32, %arg1: i32) -> (i32, i32) {
    %c0_i32 = arith.constant 0 : i32
    %c0_i32_0 = arith.constant 0 : i32
    %c0_i32_1 = arith.constant 0 : i32
    return %c0_i32, %c0_i32_0 : i32, i32
  }
  func.func @transform_5(%arg0: i32, %arg1: i32) -> (i32, i32) {
    %c0_i32 = arith.constant 0 : i32
    %c0_i32_0 = arith.constant 0 : i32
    %c0_i32_1 = arith.constant 0 : i32
    return %c0_i32, %c0_i32_0 : i32, i32
  }
  func.func @transform_6(%arg0: i32, %arg1: i32) -> (i32, i32) {
    %c0_i32 = arith.constant 0 : i32
    %c0_i32_0 = arith.constant 0 : i32
    %c0_i32_1 = arith.constant 0 : i32
    return %c0_i32, %c0_i32_0 : i32, i32
  }
  func.func @transform_7(%arg0: i32, %arg1: i32) -> (i32, i32) {
    %c0_i32 = arith.constant 0 : i32
    %c0_i32_0 = arith.constant 0 : i32
    %c0_i32_1 = arith.constant 0 : i32
    return %c0_i32, %c0_i32_0 : i32, i32
  }
  func.func @transform_8(%arg0: i32, %arg1: i32) -> (i32, i32) {
    %c0_i32 = arith.constant 0 : i32
    %c0_i32_0 = arith.constant 0 : i32
    %c0_i32_1 = arith.constant 0 : i32
    return %c0_i32, %c0_i32_0 : i32, i32
  }
  func.func @transform_9(%arg0: i32, %arg1: i32) -> (i32, i32) {
    %c0_i32 = arith.constant 0 : i32
    %c0_i32_0 = arith.constant 0 : i32
    return %arg0, %c0_i32 : i32, i32
  }
}

</mosaic_0001>

<bundles_post_ra>
// kernel: tpu_custom_call.1
= control target key start
LH: loop header
LB: loop body
LE: loop exit
PB: predicated region body
PF: predicated region fallthrough
CT: control target
= control target key end

     0   :  { %s2104_s0 = inlined_call_operand.vmem [shape: f32[1,1024], index: 0, kind: input, shape index: {}]   ;;  %s2105_s1 = inlined_call_operand.vmem [shape: f32[1,1024], index: 1, kind: input, shape index: {}]   ;;  %s2106_s2 = inlined_call_operand.vmem [shape: f32[8,128], index: 2, kind: input, shape index: {}]   ;;  %s2107_s3 = inlined_call_operand.vmem [shape: f32[32,8], index: 3, kind: input, shape index: {}]   ;;  %s2108_s4 = inlined_call_operand.vmem [shape: f32[32,1], index: 4, kind: input, shape index: {}]   ;;  %s2109_s5 = inlined_call_operand.vmem [shape: f32[32,32], index: 5, kind: input, shape index: {}]   ;;  %s2110_s6 = inlined_call_operand.vmem [shape: f32[32,1], index: 6, kind: input, shape index: {}]   ;;  %s2111_s7 = inlined_call_operand.vmem [shape: f32[1,32], index: 7, kind: input, shape index: {}]   ;;  %s2112_s8 = inlined_call_operand.<no memory space> [shape: f32[1,1], index: 8, kind: input, shape index: {}]   ;;  %s2113_s9 = inlined_call_operand.hbm [shape: f32[8,128], index: 9, kind: output, shape index: {}]  }
   0x1   :  { %v14_v0 = vstv %s2112_s8 }
   0x2   :  { %15 = vst [vmem:[#allocation3] sm:$0x1] %v14_v0 }
   0x3   :  { %v106_v1 = vlaneseq  ;;  %v1764_v2 = vmov 0.0   ;;  %v1765_v4 = vmov 0   ;;  %v280_v5 = vld [vmem:[%s2108_s4] sm:$0xff]  ;;  %vm187_vm0 = vcmask 1040384   ;;  %v282_v8 = vld [vmem:[%s2108_s4 + $0x10] sm:$0xff]  ;;  %v281_v13 = vld [vmem:[%s2108_s4 + $0x8] sm:$0xff] }
   0x4   :  { %96 = vst [vmem:[#allocation2 + $0x8] sm:$0xf0] %v1764_v2  ;;  %95 = vst [vmem:[#allocation2] sm:$0xf0] %v1764_v2  ;;  %381 = vmatprep.mubr.f32.mxu0 %v1764_v2  ;;  %470 = vmatprep.mubr.f32.mxu1 %v1764_v2  ;;  %v103_v6 = vld [vmem:[%s2104_s0] sm:$0xff]  ;;  %v283_v18 = vld [vmem:[%s2108_s4 + $0x18] sm:$0xff] }
   0x5   :  { %97 = vst [vmem:[#allocation2 + $0x10] sm:$0xf0] %v1764_v2  ;;  %98 = vst [vmem:[#allocation2 + $0x18] sm:$0xf0] %v1764_v2  ;;  %v1832_v3 = vshrl.u32 %v106_v1, 7  ;;  %1718 = vset.pattern.permute.xlu0 %v1765_v4  ;;  %1719 = vset.pattern.permute.xlu1 %v1765_v4  ;;  %v1843_v7 = vld [vmem:[%s2105_s1] sm:$0xff] }
   0x6   :  { %99 = vst [vmem:[#allocation2 + $0x20] sm:$0xf0] %v1764_v2  ;;  %100 = vst [vmem:[#allocation2 + $0x28] sm:$0xf0] %v1764_v2  ;;  %286 = vperm.xlu0 %1718, %v280_v5   ;;  %296 = vperm.xlu1 %1719, %v282_v8  }
   0x7   :  { %101 = vst [vmem:[#allocation2 + $0x30] sm:$0xf0] %v1764_v2  ;;  %102 = vst [vmem:[#allocation2 + $0x38] sm:$0xf0] %v1764_v2  ;;  %v112_v9 = vsub.s32 1, %v1832_v3  ;;  %v120_v10 = vsub.s32 3, %v1832_v3 }
   0x8   :  { %v1851_v11 = vsub.s32 0, %v1832_v3  ;;  %v116_v12 = vsub.s32 2, %v1832_v3  ;;  %v128_v14 = vsub.s32 5, %v1832_v3  ;;  %v136_v15 = vsub.s32 7, %v1832_v3 }
   0x9   :  { %v124_v16 = vsub.s32 4, %v1832_v3  ;;  %v132_v17 = vsub.s32 6, %v1832_v3  ;;  %v113_v19 = vrot.slane %v103_v6, %v112_v9  ;;  %v154_v20 = vrot.slane %v1843_v7, %v112_v9 }
   0xa   :  { %v121_v21 = vrot.slane %v103_v6, %v120_v10  ;;  %v162_v22 = vrot.slane %v1843_v7, %v120_v10 }
   0xb   :  { %16 = vsyncpa [#allocation5], 0  ;;  %v109_v23 = vrot.slane %v103_v6, %v1851_v11  ;;  %v150_v24 = vrot.slane %v1843_v7, %v1851_v11  ;;  %v117_v25 = vrot.slane %v103_v6, %v116_v12  ;;  %v158_v26 = vrot.slane %v1843_v7, %v116_v12  ;;  %291 = vperm.xlu0 %1718, %v281_v13   ;;  %v741_v31 = vld [vmem:[%s2110_s6] sm:$0xff]  ;;  %v742_v36 = vld [vmem:[%s2110_s6 + $0x8] sm:$0xff] }
   0xc   :  { %v189_v27 = vsel %vm187_vm0, %v113_v19, %v154_v20  ;;  %v197_v28 = vsel %vm187_vm0, %v154_v20, %v113_v19  ;;  %v191_v29 = vsel %vm187_vm0, %v121_v21, %v162_v22  ;;  %v199_v30 = vsel %vm187_vm0, %v162_v22, %v121_v21  ;;  %301 = vperm.xlu1 %1719, %v283_v18   ;;  %v743_v47 = vld [vmem:[%s2110_s6 + $0x10] sm:$0xff]  ;;  %v744_v51 = vld [vmem:[%s2110_s6 + $0x18] sm:$0xff]  ;;  %v1199_v60 = vld [vmem:[#allocation3] sm:$0x1] }
   0xd   :  { %205 = vst [vmem:[#allocation2 + $0x8] sm:$0x3] %v189_v27  ;;  %v213_v32 = vadd.f32 0.1, %v197_v28  ;;  %207 = vst [vmem:[#allocation2 + $0x18] sm:$0x3] %v191_v29  ;;  %v188_v34 = vsel %vm187_vm0, %v109_v23, %v150_v24  ;;  %v196_v35 = vsel %vm187_vm0, %v150_v24, %v109_v23  ;;  %v190_v38 = vsel %vm187_vm0, %v117_v25, %v158_v26 }
   0xe   :  { %v215_v33 = vadd.f32 0.1, %v199_v30  ;;  %204 = vst [vmem:[#allocation2] sm:$0x3] %v188_v34  ;;  %v212_v37 = vadd.f32 0.1, %v196_v35  ;;  %v198_v39 = vsel %vm187_vm0, %v158_v26, %v117_v25  ;;  %v129_v40 = vrot.slane %v103_v6, %v128_v14 }
   0xf   :  { %1720 = vrcp.f32 %v213_v32  ;;  %206 = vst [vmem:[#allocation2 + $0x10] sm:$0x3] %v190_v38  ;;  %v214_v41 = vadd.f32 0.1, %v198_v39  ;;  %v170_v42 = vrot.slane %v1843_v7, %v128_v14  ;;  %v137_v43 = vrot.slane %v103_v6, %v136_v15  ;;  %747 = vperm.xlu0 %1718, %v741_v31   ;;  %v276_v30 = vld [vmem:[%s2107_s3] sm:$0xff]  ;;  %v279_v39 = vld [vmem:[%s2107_s3 + $0x18] sm:$0xff] }
  0x10   :  { %1722 = vrcp.f32 %v215_v33  ;;  %v178_v44 = vrot.slane %v1843_v7, %v136_v15  ;;  %v125_v45 = vrot.slane %v103_v6, %v124_v16  ;;  %v166_v46 = vrot.slane %v1843_v7, %v124_v16  ;;  %752 = vperm.xlu1 %1719, %v742_v36   ;;  %v277_v33 = vld [vmem:[%s2107_s3 + $0x8] sm:$0xff] }
  0x11   :  { %1724 = vrcp.f32 %v212_v37  ;;  %v193_v48 = vsel %vm187_vm0, %v129_v40, %v170_v42  ;;  %v201_v49 = vsel %vm187_vm0, %v170_v42, %v129_v40  ;;  %v133_v50 = vrot.slane %v103_v6, %v132_v17 }
  0x12   :  { %1726 = vrcp.f32 %v214_v41  ;;  %209 = vst [vmem:[#allocation2 + $0x28] sm:$0x3] %v193_v48  ;;  %v217_v52 = vadd.f32 0.1, %v201_v49  ;;  %v195_v53 = vsel %vm187_vm0, %v137_v43, %v178_v44  ;;  %v203_v54 = vsel %vm187_vm0, %v178_v44, %v137_v43 }
  0x13   :  { %211 = vst [vmem:[#allocation2 + $0x38] sm:$0x3] %v195_v53  ;;  %v219_v55 = vadd.f32 0.1, %v203_v54  ;;  %v192_v56 = vsel %vm187_vm0, %v125_v45, %v166_v46  ;;  %v200_v57 = vsel %vm187_vm0, %v166_v46, %v125_v45  ;;  %v174_v58 = vrot.slane %v1843_v7, %v132_v17  ;;  %757 = vperm.xlu0 %1718, %v743_v47  }
  0x14   :  { %1728 = vrcp.f32 %v217_v52  ;;  %208 = vst [vmem:[#allocation2 + $0x20] sm:$0x3] %v192_v56  ;;  %v216_v59 = vadd.f32 0.1, %v200_v57  ;;  %762 = vperm.xlu1 %1719, %v744_v51   ;;  %vm304_vm1 = vcmask 64512   ;;  %vm765_vm2 = vcmask 261120  }
  0x15   :  { %1730 = vrcp.f32 %v219_v55  ;;  %v194_v61 = vsel %vm187_vm0, %v133_v50, %v174_v58  ;;  %v202_v62 = vsel %vm187_vm0, %v174_v58, %v133_v50 }
  0x16   :  { %1732 = vrcp.f32 %v216_v59  ;;  %210 = vst [vmem:[#allocation2 + $0x30] sm:$0x3] %v194_v61  ;;  %v218_v63 = vadd.f32 0.1, %v202_v62 }
  0x17   :  { %1202 = vperm.xlu0 %1718, %v1199_v60  }
  0x18   :  { %1734 = vrcp.f32 %v218_v63 }
  0x19   :  { %v1721_v0 = vpop.eup %1720 }
  0x1a   :  { %v1723_v4 = vpop.eup %1722  ;;  %v223_v5 = vmul.f32 %v1721_v0, %v189_v27 }
  0x1b   :  { %v1725_v6 = vpop.eup %1724  ;;  %v227_v7 = vmul.f32 %v1723_v4, %v191_v29 }
  0x1c   :  { %v1727_v8 = vpop.eup %1726  ;;  %v245_v9 = vrot.slane %v223_v5, 6  ;;  %v221_v10 = vmul.f32 %v1725_v6, %v188_v34 }
  0x1d   :  { %v247_v12 = vrot.slane %v227_v7, 6  ;;  %v225_v13 = vmul.f32 %v1727_v8, %v190_v38  ;;  %v278_v38 = vld [vmem:[%s2107_s3 + $0x10] sm:$0xff] }
  0x1e   :  { %v1729_v14 = vpop.eup %1728  ;;  %261 = vst [vmem:[#allocation2 + $0x8] sm:$0xc] %v245_v9  ;;  %v244_v15 = vrot.slane %v221_v10, 6 }
  0x1f   :  { %v1731_v16 = vpop.eup %1730  ;;  %263 = vst [vmem:[#allocation2 + $0x18] sm:$0xc] %v247_v12  ;;  %v246_v17 = vrot.slane %v225_v13, 6  ;;  %v231_v18 = vmul.f32 %v1729_v14, %v193_v48 }
  0x20   :  { %v1733_v19 = vpop.eup %1732  ;;  %260 = vst [vmem:[#allocation2] sm:$0xc] %v244_v15  ;;  %v235_v20 = vmul.f32 %v1731_v16, %v195_v53 }
  0x21   :  { %262 = vst [vmem:[#allocation2 + $0x10] sm:$0xc] %v246_v17  ;;  %v249_v21 = vrot.slane %v231_v18, 6  ;;  %v229_v22 = vmul.f32 %v1733_v19, %v192_v56 }
  0x22   :  { %v1735_v23 = vpop.eup %1734  ;;  %v251_v24 = vrot.slane %v235_v20, 6 }
  0x23   :  { %265 = vst [vmem:[#allocation2 + $0x28] sm:$0xc] %v249_v21  ;;  %v248_v25 = vrot.slane %v229_v22, 6  ;;  %v233_v26 = vmul.f32 %v1735_v23, %v194_v61 }
  0x24   :  { %267 = vst [vmem:[#allocation2 + $0x38] sm:$0xc] %v251_v24 }
  0x25   :  { %v269_v27 = vld [vmem:[#allocation2 + $0x8] sm:$0xff]  ;;  %264 = vst [vmem:[#allocation2 + $0x20] sm:$0xc] %v248_v25  ;;  %v250_v28 = vrot.slane %v233_v26, 6 }
  0x26   :  { %317 = vmatprep.subr.mxu0 %v269_v27  ;;  %v271_v29 = vld [vmem:[#allocation2 + $0x18] sm:$0xff] }
  0x27   :  { %406 = vmatprep.subr.mxu1 %v271_v29  ;;  %v268_v31 = vld [vmem:[#allocation2] sm:$0xff]  ;;  %266 = vst [vmem:[#allocation2 + $0x30] sm:$0xc] %v250_v28 }
  0x28   :  { %318 = vmatpush1.msra.mxu0 %v268_v31  ;;  %v270_v32 = vld [vmem:[#allocation2 + $0x10] sm:$0xff] }
  0x29   :  { %407 = vmatpush1.msra.mxu1 %v270_v32  ;;  %1614 = vmatmul.mubr.msk.f32.vlgmr.msra.gmra.mrb[0].mxu0 %vm304_vm1, %v276_v30 }
  0x2a   :  { %1618 = vmatmul.mubr.msk.f32.vlgmr.msra.gmra.mrb[0].mxu1 %vm304_vm1, %v276_v30  ;;  %387 = vmatprep.mubr.f32.mxu0 %v1764_v2  ;;  %v273_v34 = vld [vmem:[#allocation2 + $0x28] sm:$0xff] }
  0x2b   :  { %476 = vmatprep.mubr.f32.mxu1 %v1764_v2  ;;  %495 = vmatprep.subr.mxu0 %v273_v34  ;;  %v275_v35 = vld [vmem:[#allocation2 + $0x38] sm:$0xff] }
  0x2c   :  { %584 = vmatprep.subr.mxu1 %v275_v35  ;;  %v272_v36 = vld [vmem:[#allocation2 + $0x20] sm:$0xff] }
  0x2d   :  { %1615 = vmatmul.mubr.msk.f32.gmra.mrb[2].mxu0 %vm304_vm1, %v277_v33 }
  0x2e   :  { %1619 = vmatmul.mubr.msk.f32.gmra.mrb[2].mxu1 %vm304_vm1, %v277_v33  ;;  %496 = vmatpush1.msra.mxu0 %v272_v36  ;;  %v274_v37 = vld [vmem:[#allocation2 + $0x30] sm:$0xff] }
  0x2f   :  { %585 = vmatpush1.msra.mxu1 %v274_v37  ;;  %393 = vmatprep.mubr.f32.mxu0 %v1764_v2 }
  0x30   :  { %482 = vmatprep.mubr.f32.mxu1 %v1764_v2 }
  0x31   :  { %1616 = vmatmul.mubr.msk.f32.gmra.mrb[4].mxu0 %vm304_vm1, %v278_v38 }
  0x32   :  { %1620 = vmatmul.mubr.msk.f32.gmra.mrb[4].mxu1 %vm304_vm1, %v278_v38  ;;  %399 = vmatprep.mubr.f32.mxu0 %v1764_v2 }
  0x33   :  { %488 = vmatprep.mubr.f32.mxu1 %v1764_v2 }
  0x35   :  { %1617 = vmatmul.mubr.msk.f32.gmra.mrb[6].mxu0 %vm304_vm1, %v279_v39 }
  0x36   :  { %1621 = vmatmul.mubr.msk.f32.gmra.mrb[6].mxu1 %vm304_vm1, %v279_v39  ;;  %559 = vmatprep.mubr.f32.mxu0 %v1764_v2 }
  0x37   :  { %648 = vmatprep.mubr.f32.mxu1 %v1764_v2 }
  0x39   :  { %1622 = vmatmul.mubr.msk.f32.vlgmr.msra.gmra.mrb[8].mxu0 %vm304_vm1, %v276_v30 }
  0x3a   :  { %1626 = vmatmul.mubr.msk.f32.vlgmr.msra.gmra.mrb[8].mxu1 %vm304_vm1, %v276_v30  ;;  %565 = vmatprep.mubr.f32.mxu0 %v1764_v2 }
  0x3b   :  { %654 = vmatprep.mubr.f32.mxu1 %v1764_v2 }
  0x3d   :  { %1623 = vmatmul.mubr.msk.f32.gmra.mrb[10].mxu0 %vm304_vm1, %v277_v33 }
  0x3e   :  { %1627 = vmatmul.mubr.msk.f32.gmra.mrb[10].mxu1 %vm304_vm1, %v277_v33  ;;  %571 = vmatprep.mubr.f32.mxu0 %v1764_v2 }
  0x3f   :  { %660 = vmatprep.mubr.f32.mxu1 %v1764_v2 }
  0x41   :  { %1624 = vmatmul.mubr.msk.f32.gmra.mrb[12].mxu0 %vm304_vm1, %v278_v38 }
  0x42   :  { %1628 = vmatmul.mubr.msk.f32.gmra.mrb[12].mxu1 %vm304_vm1, %v278_v38  ;;  %577 = vmatprep.mubr.f32.mxu0 %v1764_v2 }
  0x43   :  { %666 = vmatprep.mubr.f32.mxu1 %v1764_v2 }
  0x45   :  { %1625 = vmatmul.mubr.msk.f32.gmra.mrb[14].mxu0 %vm304_vm1, %v279_v39 }
  0x46   :  { %1629 = vmatmul.mubr.msk.f32.gmra.mrb[14].mxu1 %vm304_vm1, %v279_v39  ;;  %842 = vmatprep.mubr.f32.mxu0 %v1764_v2 }
  0x47   :  { %931 = vmatprep.mubr.f32.mxu1 %v1764_v2 }
  0x85   :  { %v1946_v40 = vpop.permute.xlu0 %286  ;;  %v1955_v58 = vpop.permute.xlu1 %296 }
  0x8a   :  { %v1952_v50 = vpop.permute.xlu0 %291 }
  0x8b   :  { %v1964_v25 = vpop.permute.xlu1 %301 }
  0xfc   :  { %v383_v41 = vpop.f32.mrb[0].mxu0 }
  0xfd   :  { %v384_v42 = vadd.f32 %v383_v41, %v1946_v40  ;;  %v472_v43 = vpop.f32.mrb[0].mxu1  ;;  %v385_v44 = vpop.f32.mrb[1].mxu0 }
  0xfe   :  { %v473_v45 = vadd.f32 %v472_v43, %v1946_v40  ;;  %v386_v46 = vadd.f32 %v385_v44, %v1946_v40  ;;  %v474_v47 = vpop.f32.mrb[1].mxu1 }
  0xff   :  { %v673_v48 = vmul.f32 0.2, %v384_v42  ;;  %v475_v49 = vadd.f32 %v474_v47, %v1946_v40 }
 0x100   :  { %v675_v51 = vmul.f32 0.2, %v473_v45  ;;  %v674_v52 = vmul.f32 0.2, %v386_v46  ;;  %v389_v53 = vpop.f32.mrb[2].mxu0 }
 0x101   :  { %v676_v54 = vmul.f32 0.2, %v475_v49  ;;  %v390_v55 = vadd.f32 %v389_v53, %v1952_v50  ;;  %v478_v56 = vpop.f32.mrb[2].mxu1  ;;  %v391_v57 = vpop.f32.mrb[3].mxu0  ;;  %v705_v62 = vmax.f32 %v384_v42, %v673_v48 }
 0x102   :  { %v479_v59 = vadd.f32 %v478_v56, %v1952_v50  ;;  %v392_v60 = vadd.f32 %v391_v57, %v1952_v50  ;;  %v480_v61 = vpop.f32.mrb[3].mxu1  ;;  %v707_v4 = vmax.f32 %v473_v45, %v675_v51  ;;  %v706_v5 = vmax.f32 %v386_v46, %v674_v52 }
 0x103   :  { %v681_v63 = vmul.f32 0.2, %v390_v55  ;;  %v481_v0 = vadd.f32 %v480_v61, %v1952_v50  ;;  %v708_v9 = vmax.f32 %v475_v49, %v676_v54 }
 0x104   :  { %v683_v6 = vmul.f32 0.2, %v479_v59  ;;  %v682_v7 = vmul.f32 0.2, %v392_v60  ;;  %v395_v8 = vpop.f32.mrb[4].mxu0 }
 0x105   :  { %v713_v10 = vmax.f32 %v390_v55, %v681_v63  ;;  %v684_v12 = vmul.f32 0.2, %v481_v0  ;;  %v396_v13 = vadd.f32 %v395_v8, %v1955_v58  ;;  %v484_v14 = vpop.f32.mrb[4].mxu1  ;;  %v397_v15 = vpop.f32.mrb[5].mxu0 }
 0x106   :  { %v715_v16 = vmax.f32 %v479_v59, %v683_v6  ;;  %v714_v17 = vmax.f32 %v392_v60, %v682_v7  ;;  %v485_v18 = vadd.f32 %v484_v14, %v1955_v58  ;;  %v398_v19 = vadd.f32 %v397_v15, %v1955_v58  ;;  %v486_v20 = vpop.f32.mrb[5].mxu1 }
 0x107   :  { %v1652_v21 = vpack.c.bf16 %v713_v10, %v705_v62  ;;  %v716_v22 = vmax.f32 %v481_v0, %v684_v12  ;;  %v689_v23 = vmul.f32 0.2, %v396_v13  ;;  %v487_v24 = vadd.f32 %v486_v20, %v1955_v58  ;;  %v1981_v20 = vld [vmem:[%s2109_s5] sm:$0xff] }
 0x108   :  { %v1660_v26 = vpack.c.bf16 %v715_v16, %v707_v4  ;;  %v691_v27 = vmul.f32 0.2, %v485_v18  ;;  %v690_v28 = vmul.f32 0.2, %v398_v19  ;;  %v401_v29 = vpop.f32.mrb[6].mxu0  ;;  %v1650_v30 = vpack.c.bf16 %v714_v17, %v706_v5 }
 0x109   :  { %v692_v31 = vmul.f32 0.2, %v487_v24  ;;  %v402_v32 = vadd.f32 %v401_v29, %v1964_v25  ;;  %v490_v33 = vpop.f32.mrb[6].mxu1  ;;  %v403_v34 = vpop.f32.mrb[7].mxu0  ;;  %v1658_v35 = vpack.c.bf16 %v716_v22, %v708_v9  ;;  %v721_v39 = vmax.f32 %v396_v13, %v689_v23 }
 0x10a   :  { %v491_v36 = vadd.f32 %v490_v33, %v1964_v25  ;;  %v404_v37 = vadd.f32 %v403_v34, %v1964_v25  ;;  %v492_v38 = vpop.f32.mrb[7].mxu1  ;;  %1651 = vmatprep.subr.bf16.mxu0 %v1650_v30  ;;  %v723_v43 = vmax.f32 %v485_v18, %v691_v27  ;;  %v722_v44 = vmax.f32 %v398_v19, %v690_v28 }
 0x10b   :  { %v697_v41 = vmul.f32 0.2, %v402_v32  ;;  %v493_v42 = vadd.f32 %v492_v38, %v1964_v25  ;;  %1659 = vmatprep.subr.bf16.mxu1 %v1658_v35  ;;  %1653 = vmatpush1.bf16.msra.mxu0 %v1652_v21  ;;  %v724_v48 = vmax.f32 %v487_v24, %v692_v31 }
 0x10c   :  { %v699_v45 = vmul.f32 0.2, %v491_v36  ;;  %v698_v46 = vmul.f32 0.2, %v404_v37  ;;  %1661 = vmatpush1.bf16.msra.mxu1 %v1660_v26  ;;  %v561_v47 = vpop.f32.mrb[8].mxu0 }
 0x10d   :  { %v729_v49 = vmax.f32 %v402_v32, %v697_v41  ;;  %v700_v51 = vmul.f32 0.2, %v493_v42  ;;  %v562_v52 = vadd.f32 %v561_v47, %v1946_v40  ;;  %v650_v53 = vpop.f32.mrb[8].mxu1  ;;  %v563_v54 = vpop.f32.mrb[9].mxu0  ;;  %v738_v41 = vld [vmem:[%s2109_s5 + $0x8] sm:$0xff] }
 0x10e   :  { %v731_v55 = vmax.f32 %v491_v36, %v699_v45  ;;  %v730_v56 = vmax.f32 %v404_v37, %v698_v46  ;;  %v651_v57 = vadd.f32 %v650_v53, %v1946_v40  ;;  %v564_v59 = vadd.f32 %v563_v54, %v1946_v40  ;;  %v652_v60 = vpop.f32.mrb[9].mxu1 }
 0x10f   :  { %v1656_v61 = vpack.c.bf16 %v729_v49, %v721_v39  ;;  %v732_v62 = vmax.f32 %v493_v42, %v700_v51  ;;  %v677_v63 = vmul.f32 0.2, %v562_v52  ;;  %v653_v0 = vadd.f32 %v652_v60, %v1946_v40 }
 0x110   :  { %v1664_v4 = vpack.c.bf16 %v731_v55, %v723_v43  ;;  %v679_v5 = vmul.f32 0.2, %v651_v57  ;;  %v678_v6 = vmul.f32 0.2, %v564_v59  ;;  %v567_v7 = vpop.f32.mrb[10].mxu0  ;;  %v1654_v8 = vpack.c.bf16 %v730_v56, %v722_v44 }
 0x111   :  { %v680_v9 = vmul.f32 0.2, %v653_v0  ;;  %v568_v10 = vadd.f32 %v567_v7, %v1952_v50  ;;  %v656_v12 = vpop.f32.mrb[10].mxu1  ;;  %v569_v13 = vpop.f32.mrb[11].mxu0  ;;  %v1662_v14 = vpack.c.bf16 %v732_v62, %v724_v48  ;;  %v709_v18 = vmax.f32 %v562_v52, %v677_v63 }
 0x112   :  { %v657_v15 = vadd.f32 %v656_v12, %v1952_v50  ;;  %v570_v16 = vadd.f32 %v569_v13, %v1952_v50  ;;  %v658_v17 = vpop.f32.mrb[11].mxu1  ;;  %1655 = vmatprep.subr.bf16.mxu0 %v1654_v8  ;;  %v711_v21 = vmax.f32 %v651_v57, %v679_v5  ;;  %v710_v22 = vmax.f32 %v564_v59, %v678_v6  ;;  %v739_v59 = vld [vmem:[%s2109_s5 + $0x10] sm:$0xff] }
 0x113   :  { %v685_v19 = vmul.f32 0.2, %v568_v10  ;;  %v659_v40 = vadd.f32 %v658_v17, %v1952_v50  ;;  %1663 = vmatprep.subr.bf16.mxu1 %v1662_v14  ;;  %1657 = vmatpush1.bf16.msra.mxu0 %v1656_v61  ;;  %v712_v27 = vmax.f32 %v653_v0, %v680_v9 }
 0x114   :  { %v687_v23 = vmul.f32 0.2, %v657_v15  ;;  %v686_v24 = vmul.f32 0.2, %v570_v16  ;;  %1665 = vmatpush1.bf16.msra.mxu1 %v1664_v4  ;;  %v573_v26 = vpop.f32.mrb[12].mxu0 }
 0x115   :  { %v717_v28 = vmax.f32 %v568_v10, %v685_v19  ;;  %v688_v29 = vmul.f32 0.2, %v659_v40  ;;  %v574_v30 = vadd.f32 %v573_v26, %v1955_v58  ;;  %v662_v50 = vpop.f32.mrb[12].mxu1  ;;  %v575_v31 = vpop.f32.mrb[13].mxu0  ;;  %v740_v10 = vld [vmem:[%s2109_s5 + $0x18] sm:$0xff] }
 0x116   :  { %v719_v32 = vmax.f32 %v657_v15, %v687_v23  ;;  %v718_v33 = vmax.f32 %v570_v16, %v686_v24  ;;  %v663_v34 = vadd.f32 %v662_v50, %v1955_v58  ;;  %v576_v35 = vadd.f32 %v575_v31, %v1955_v58  ;;  %v664_v36 = vpop.f32.mrb[13].mxu1  ;;  %1630 = vmatmul.mubr.msk.f32.vlgmr.msra.gmra.mrb[16].mxu0 %vm765_vm2, %v1981_v20  ;;  %v2036_v15 = vpop.permute.xlu0 %747 }
 0x117   :  { %v1668_v37 = vpack.c.bf16 %v717_v28, %v709_v18  ;;  %v720_v38 = vmax.f32 %v659_v40, %v688_v29  ;;  %v665_v39 = vadd.f32 %v664_v36, %v1955_v58  ;;  %1634 = vmatmul.mubr.msk.f32.vlgmr.msra.gmra.mrb[16].mxu1 %vm765_vm2, %v1981_v20  ;;  %848 = vmatprep.mubr.f32.mxu0 %v1764_v2  ;;  %v693_v45 = vmul.f32 0.2, %v574_v30  ;;  %v2042_v23 = vpop.permute.xlu1 %752 }
 0x118   :  { %v1676_v42 = vpack.c.bf16 %v719_v32, %v711_v21  ;;  %v579_v43 = vpop.f32.mrb[14].mxu0  ;;  %937 = vmatprep.mubr.f32.mxu1 %v1764_v2  ;;  %v1666_v44 = vpack.c.bf16 %v718_v33, %v710_v22  ;;  %v695_v46 = vmul.f32 0.2, %v663_v34  ;;  %v694_v51 = vmul.f32 0.2, %v576_v35 }
 0x119   :  { %v580_v47 = vadd.f32 %v579_v43, %v1964_v25  ;;  %v668_v48 = vpop.f32.mrb[14].mxu1  ;;  %v581_v58 = vpop.f32.mrb[15].mxu0  ;;  %v1674_v49 = vpack.c.bf16 %v720_v38, %v712_v27  ;;  %v696_v55 = vmul.f32 0.2, %v665_v39  ;;  %v725_v62 = vmax.f32 %v574_v30, %v693_v45 }
 0x11a   :  { %v669_v52 = vadd.f32 %v668_v48, %v1964_v25  ;;  %v582_v53 = vadd.f32 %v581_v58, %v1964_v25  ;;  %v670_v54 = vpop.f32.mrb[15].mxu1  ;;  %1631 = vmatmul.mubr.msk.f32.gmra.mrb[18].mxu0 %vm765_vm2, %v738_v41  ;;  %1667 = vmatprep.subr.bf16.mxu0 %v1666_v44  ;;  %v727_v63 = vmax.f32 %v663_v34, %v695_v46 }
 0x11b   :  { %v701_v56 = vmul.f32 0.2, %v580_v47  ;;  %v671_v57 = vadd.f32 %v670_v54, %v1964_v25  ;;  %1635 = vmatmul.mubr.msk.f32.gmra.mrb[18].mxu1 %vm765_vm2, %v738_v41  ;;  %1675 = vmatprep.subr.bf16.mxu1 %v1674_v49  ;;  %v726_v5 = vmax.f32 %v576_v35, %v694_v51  ;;  %v728_v7 = vmax.f32 %v665_v39, %v696_v55 }
 0x11c   :  { %v703_v60 = vmul.f32 0.2, %v669_v52  ;;  %v702_v61 = vmul.f32 0.2, %v582_v53  ;;  %1669 = vmatpush1.bf16.msra.mxu0 %v1668_v37  ;;  %1677 = vmatpush1.bf16.msra.mxu1 %v1676_v42  ;;  %v2048_v37 = vpop.permute.xlu0 %757 }
 0x11d   :  { %v733_v0 = vmax.f32 %v580_v47, %v701_v56  ;;  %v704_v4 = vmul.f32 0.2, %v671_v57  ;;  %854 = vmatprep.mubr.f32.mxu0 %v1764_v2  ;;  %943 = vmatprep.mubr.f32.mxu1 %v1764_v2 }
 0x11e   :  { %v735_v25 = vmax.f32 %v669_v52, %v703_v60  ;;  %v734_v6 = vmax.f32 %v582_v53, %v702_v61  ;;  %1632 = vmatmul.mubr.msk.f32.gmra.mrb[20].mxu0 %vm765_vm2, %v739_v59  ;;  %v2054_v60 = vpop.permute.xlu1 %762 }
 0x11f   :  { %v1672_v8 = vpack.c.bf16 %v733_v0, %v725_v62  ;;  %v736_v9 = vmax.f32 %v671_v57, %v704_v4  ;;  %1636 = vmatmul.mubr.msk.f32.gmra.mrb[20].mxu1 %vm765_vm2, %v739_v59  ;;  %860 = vmatprep.mubr.f32.mxu0 %v1764_v2 }
 0x120   :  { %v1680_v12 = vpack.c.bf16 %v735_v25, %v727_v63  ;;  %949 = vmatprep.mubr.f32.mxu1 %v1764_v2  ;;  %v1670_v13 = vpack.c.bf16 %v734_v6, %v726_v5 }
 0x121   :  { %v1678_v14 = vpack.c.bf16 %v736_v9, %v728_v7 }
 0x122   :  { %1633 = vmatmul.mubr.msk.f32.gmra.mrb[22].mxu0 %vm765_vm2, %v740_v10  ;;  %1671 = vmatprep.subr.bf16.mxu0 %v1670_v13 }
 0x123   :  { %1637 = vmatmul.mubr.msk.f32.gmra.mrb[22].mxu1 %vm765_vm2, %v740_v10  ;;  %1679 = vmatprep.subr.bf16.mxu1 %v1678_v14 }
 0x124   :  { %1673 = vmatpush1.bf16.msra.mxu0 %v1672_v8  ;;  %1681 = vmatpush1.bf16.msra.mxu1 %v1680_v12 }
 0x125   :  { %1020 = vmatprep.mubr.f32.mxu0 %v1764_v2  ;;  %1109 = vmatprep.mubr.f32.mxu1 %v1764_v2 }
 0x127   :  { %1638 = vmatmul.mubr.msk.f32.vlgmr.msra.gmra.mrb[24].mxu0 %vm765_vm2, %v1981_v20  ;;  %1642 = vmatmul.mubr.msk.f32.vlgmr.msra.gmra.mrb[24].mxu1 %vm765_vm2, %v1981_v20 }
 0x128   :  { %1026 = vmatprep.mubr.f32.mxu0 %v1764_v2  ;;  %1115 = vmatprep.mubr.f32.mxu1 %v1764_v2 }
 0x12b   :  { %1639 = vmatmul.mubr.msk.f32.gmra.mrb[26].mxu0 %vm765_vm2, %v738_v41  ;;  %1643 = vmatmul.mubr.msk.f32.gmra.mrb[26].mxu1 %vm765_vm2, %v738_v41 }
 0x12c   :  { %1032 = vmatprep.mubr.f32.mxu0 %v1764_v2  ;;  %1121 = vmatprep.mubr.f32.mxu1 %v1764_v2 }
 0x12f   :  { %1640 = vmatmul.mubr.msk.f32.gmra.mrb[28].mxu0 %vm765_vm2, %v739_v59  ;;  %1644 = vmatmul.mubr.msk.f32.gmra.mrb[28].mxu1 %vm765_vm2, %v739_v59 }
 0x130   :  { %1038 = vmatprep.mubr.f32.mxu0 %v1764_v2  ;;  %1127 = vmatprep.mubr.f32.mxu1 %v1764_v2 }
 0x133   :  { %1641 = vmatmul.mubr.msk.f32.gmra.mrb[30].mxu0 %vm765_vm2, %v740_v10  ;;  %1645 = vmatmul.mubr.msk.f32.gmra.mrb[30].mxu1 %vm765_vm2, %v740_v10 }
 0x134   :  { %1276 = vmatprep.mubr.f32.mxu0 %v1764_v2  ;;  %1347 = vmatprep.mubr.f32.mxu1 %v1764_v2 }
 0x1e9   :  { %v844_v16 = vpop.f32.mrb[16].mxu0 }
 0x1ea   :  { %v845_v17 = vadd.f32 %v844_v16, %v2036_v15  ;;  %v933_v18 = vpop.f32.mrb[16].mxu1  ;;  %v846_v19 = vpop.f32.mrb[17].mxu0 }
 0x1eb   :  { %v934_v40 = vadd.f32 %v933_v18, %v2036_v15  ;;  %v847_v20 = vadd.f32 %v846_v19, %v2036_v15  ;;  %v935_v21 = vpop.f32.mrb[17].mxu1 }
 0x1ec   :  { %v936_v22 = vadd.f32 %v935_v21, %v2036_v15  ;;  %v1134_v24 = vmul.f32 0.2, %v845_v17 }
 0x1ed   :  { %v1136_v26 = vmul.f32 0.2, %v934_v40  ;;  %v850_v27 = vpop.f32.mrb[18].mxu0  ;;  %v1135_v28 = vmul.f32 0.2, %v847_v20 }
 0x1ee   :  { %v851_v29 = vadd.f32 %v850_v27, %v2042_v23  ;;  %v939_v30 = vpop.f32.mrb[18].mxu1  ;;  %v852_v50 = vpop.f32.mrb[19].mxu0  ;;  %v1137_v34 = vmul.f32 0.2, %v936_v22  ;;  %v1166_v38 = vmax.f32 %v845_v17, %v1134_v24 }
 0x1ef   :  { %v940_v31 = vadd.f32 %v939_v30, %v2042_v23  ;;  %v853_v32 = vadd.f32 %v852_v50, %v2042_v23  ;;  %v941_v33 = vpop.f32.mrb[19].mxu1  ;;  %v1168_v39 = vmax.f32 %v934_v40, %v1136_v26  ;;  %v1167_v44 = vmax.f32 %v847_v20, %v1135_v28 }
 0x1f0   :  { %v1142_v35 = vmul.f32 0.2, %v851_v29  ;;  %v942_v36 = vadd.f32 %v941_v33, %v2042_v23  ;;  %v1169_v55 = vmax.f32 %v936_v22, %v1137_v34 }
 0x1f1   :  { %v1144_v41 = vmul.f32 0.2, %v940_v31  ;;  %v1143_v42 = vmul.f32 0.2, %v853_v32  ;;  %v856_v43 = vpop.f32.mrb[20].mxu0 }
 0x1f2   :  { %v1174_v45 = vmax.f32 %v851_v29, %v1142_v35  ;;  %v1145_v46 = vmul.f32 0.2, %v942_v36  ;;  %v857_v47 = vadd.f32 %v856_v43, %v2048_v37  ;;  %v945_v48 = vpop.f32.mrb[20].mxu1  ;;  %v858_v58 = vpop.f32.mrb[21].mxu0 }
 0x1f3   :  { %v1176_v49 = vmax.f32 %v940_v31, %v1144_v41  ;;  %v1175_v51 = vmax.f32 %v853_v32, %v1143_v42  ;;  %v946_v52 = vadd.f32 %v945_v48, %v2048_v37  ;;  %v859_v53 = vadd.f32 %v858_v58, %v2048_v37  ;;  %v947_v54 = vpop.f32.mrb[21].mxu1 }
 0x1f4   :  { %v1684_v56 = vpack.c.bf16 %v1174_v45, %v1166_v38  ;;  %v1177_v57 = vmax.f32 %v942_v36, %v1145_v46  ;;  %v948_v59 = vadd.f32 %v947_v54, %v2048_v37  ;;  %v1150_v62 = vmul.f32 0.2, %v857_v47 }
 0x1f5   :  { %v1692_v61 = vpack.c.bf16 %v1176_v49, %v1168_v39  ;;  %v1152_v63 = vmul.f32 0.2, %v946_v52  ;;  %v862_v0 = vpop.f32.mrb[22].mxu0  ;;  %v1682_v4 = vpack.c.bf16 %v1175_v51, %v1167_v44  ;;  %v1151_v5 = vmul.f32 0.2, %v859_v53 }
 0x1f6   :  { %v1153_v25 = vmul.f32 0.2, %v948_v59  ;;  %v863_v6 = vadd.f32 %v862_v0, %v2054_v60  ;;  %v951_v7 = vpop.f32.mrb[22].mxu1  ;;  %v864_v8 = vpop.f32.mrb[23].mxu0  ;;  %v1690_v9 = vpack.c.bf16 %v1177_v57, %v1169_v55  ;;  %v1182_v17 = vmax.f32 %v857_v47, %v1150_v62  ;;  %v1198_v57 = vld [vmem:[%s2111_s7] sm:$0x1] }
 0x1f7   :  { %v952_v10 = vadd.f32 %v951_v7, %v2054_v60  ;;  %v865_v12 = vadd.f32 %v864_v8, %v2054_v60  ;;  %v953_v13 = vpop.f32.mrb[23].mxu1  ;;  %1683 = vmatprep.subr.bf16.mxu0 %v1682_v4  ;;  %v1184_v18 = vmax.f32 %v946_v52, %v1152_v63  ;;  %v1183_v20 = vmax.f32 %v859_v53, %v1151_v5 }
 0x1f8   :  { %v1158_v14 = vmul.f32 0.2, %v863_v6  ;;  %v954_v16 = vadd.f32 %v953_v13, %v2054_v60  ;;  %1691 = vmatprep.subr.bf16.mxu1 %v1690_v9  ;;  %1685 = vmatpush1.bf16.msra.mxu0 %v1684_v56  ;;  %v1185_v21 = vmax.f32 %v948_v59, %v1153_v25 }
 0x1f9   :  { %v1160_v19 = vmul.f32 0.2, %v952_v10  ;;  %v1159_v40 = vmul.f32 0.2, %v865_v12  ;;  %1693 = vmatpush1.bf16.msra.mxu1 %v1692_v61 }
 0x1fa   :  { %v1190_v22 = vmax.f32 %v863_v6, %v1158_v14  ;;  %v1161_v24 = vmul.f32 0.2, %v954_v16  ;;  %v1022_v26 = vpop.f32.mrb[24].mxu0  ;;  %v1111_v27 = vpop.f32.mrb[24].mxu1 }
 0x1fb   :  { %v1192_v28 = vmax.f32 %v952_v10, %v1160_v19  ;;  %v1191_v29 = vmax.f32 %v865_v12, %v1159_v40  ;;  %v1023_v30 = vadd.f32 %v1022_v26, %v2036_v15  ;;  %v1112_v50 = vadd.f32 %v1111_v27, %v2036_v15  ;;  %v1024_v31 = vpop.f32.mrb[25].mxu0  ;;  %v1113_v32 = vpop.f32.mrb[25].mxu1 }
 0x1fc   :  { %v1688_v33 = vpack.c.bf16 %v1190_v22, %v1182_v17  ;;  %v1193_v34 = vmax.f32 %v954_v16, %v1161_v24  ;;  %v1025_v35 = vadd.f32 %v1024_v31, %v2036_v15  ;;  %v1114_v36 = vadd.f32 %v1113_v32, %v2036_v15 }
 0x1fd   :  { %v1696_v38 = vpack.c.bf16 %v1192_v28, %v1184_v18  ;;  %v1138_v39 = vmul.f32 0.2, %v1023_v30  ;;  %v1140_v41 = vmul.f32 0.2, %v1112_v50  ;;  %v1686_v42 = vpack.c.bf16 %v1191_v29, %v1183_v20 }
 0x1fe   :  { %v1139_v43 = vmul.f32 0.2, %v1025_v35  ;;  %v1141_v44 = vmul.f32 0.2, %v1114_v36  ;;  %v1028_v45 = vpop.f32.mrb[26].mxu0  ;;  %v1117_v46 = vpop.f32.mrb[26].mxu1  ;;  %v1694_v47 = vpack.c.bf16 %v1193_v34, %v1185_v21 }
 0x1ff   :  { %v1029_v48 = vadd.f32 %v1028_v45, %v2042_v23  ;;  %v1118_v58 = vadd.f32 %v1117_v46, %v2042_v23  ;;  %v1030_v49 = vpop.f32.mrb[27].mxu0  ;;  %v1119_v51 = vpop.f32.mrb[27].mxu1  ;;  %1687 = vmatprep.subr.bf16.mxu0 %v1686_v42  ;;  %v1170_v53 = vmax.f32 %v1023_v30, %v1138_v39  ;;  %v1172_v54 = vmax.f32 %v1112_v50, %v1140_v41 }
 0x200   :  { %v1031_v52 = vadd.f32 %v1030_v49, %v2042_v23  ;;  %v1120_v15 = vadd.f32 %v1119_v51, %v2042_v23  ;;  %1695 = vmatprep.subr.bf16.mxu1 %v1694_v47  ;;  %1689 = vmatpush1.bf16.msra.mxu0 %v1688_v33  ;;  %v1171_v59 = vmax.f32 %v1025_v35, %v1139_v43  ;;  %v1766_v46 = vmov 1966171168  }
 0x201   :  { %v1146_v55 = vmul.f32 0.2, %v1029_v48  ;;  %v1148_v56 = vmul.f32 0.2, %v1118_v58  ;;  %1697 = vmatpush1.bf16.msra.mxu1 %v1696_v38  ;;  %v1173_v61 = vmax.f32 %v1114_v36, %v1141_v44  ;;  %v1509_v47 = vunpack.c.l.s4 %v1766_v46 }
 0x202   :  { %v1147_v62 = vmul.f32 0.2, %v1031_v52  ;;  %v1149_v63 = vmul.f32 0.2, %v1120_v15  ;;  %v1034_v0 = vpop.f32.mrb[28].mxu0  ;;  %v1123_v4 = vpop.f32.mrb[28].mxu1 }
 0x203   :  { %v1178_v5 = vmax.f32 %v1029_v48, %v1146_v55  ;;  %v1180_v25 = vmax.f32 %v1118_v58, %v1148_v56  ;;  %v1035_v23 = vadd.f32 %v1034_v0, %v2048_v37  ;;  %v1124_v6 = vadd.f32 %v1123_v4, %v2048_v37  ;;  %v1036_v7 = vpop.f32.mrb[29].mxu0  ;;  %v1125_v8 = vpop.f32.mrb[29].mxu1  ;;  %1646 = vmatmul.mubr.msk.f32.vlgmr.msra.gmra.mrb[32].mxu0 %vm765_vm2, %v1198_v57 }
 0x204   :  { %v1179_v9 = vmax.f32 %v1031_v52, %v1147_v62  ;;  %v1181_v10 = vmax.f32 %v1120_v15, %v1149_v63  ;;  %v1037_v12 = vadd.f32 %v1036_v7, %v2048_v37  ;;  %v1126_v13 = vadd.f32 %v1125_v8, %v2048_v37  ;;  %1647 = vmatmul.mubr.msk.f32.vlgmr.msra.gmra.mrb[32].mxu1 %vm765_vm2, %v1198_v57  ;;  %v1203_v48 = vpop.permute.xlu0 %1202 }
 0x205   :  { %v1700_v14 = vpack.c.bf16 %v1178_v5, %v1170_v53  ;;  %v1708_v16 = vpack.c.bf16 %v1180_v25, %v1172_v54  ;;  %1418 = vmatprep.mubr.f32.mxu0 %v1764_v2  ;;  %1489 = vmatprep.mubr.f32.mxu1 %v1764_v2  ;;  %v1154_v20 = vmul.f32 0.2, %v1035_v23  ;;  %v1156_v21 = vmul.f32 0.2, %v1124_v6 }
 0x206   :  { %v1040_v17 = vpop.f32.mrb[30].mxu0  ;;  %v1129_v18 = vpop.f32.mrb[30].mxu1  ;;  %v1698_v19 = vpack.c.bf16 %v1179_v9, %v1171_v59  ;;  %v1706_v40 = vpack.c.bf16 %v1181_v10, %v1173_v61  ;;  %v1155_v27 = vmul.f32 0.2, %v1037_v12  ;;  %v1157_v28 = vmul.f32 0.2, %v1126_v13 }
 0x207   :  { %v1041_v22 = vadd.f32 %v1040_v17, %v2054_v60  ;;  %v1130_v37 = vadd.f32 %v1129_v18, %v2054_v60  ;;  %v1042_v24 = vpop.f32.mrb[31].mxu0  ;;  %v1131_v26 = vpop.f32.mrb[31].mxu1  ;;  %v1186_v33 = vmax.f32 %v1035_v23, %v1154_v20  ;;  %v1188_v34 = vmax.f32 %v1124_v6, %v1156_v21 }
 0x208   :  { %v1043_v29 = vadd.f32 %v1042_v24, %v2054_v60  ;;  %v1132_v30 = vadd.f32 %v1131_v26, %v2054_v60  ;;  %1699 = vmatprep.subr.bf16.mxu0 %v1698_v19  ;;  %1707 = vmatprep.subr.bf16.mxu1 %v1706_v40  ;;  %v1187_v38 = vmax.f32 %v1037_v12, %v1155_v27  ;;  %v1510_v58 = vunpack.c.0.s8 %v1509_v47  ;;  %v1554_v24 = vld [vmem:[%s2106_s2] sm:$0xff]  ;;  %s1767_s2 = smov [#allocation4]  }
 0x209   :  { %v1162_v50 = vmul.f32 0.2, %v1041_v22  ;;  %v1164_v31 = vmul.f32 0.2, %v1130_v37  ;;  %1701 = vmatpush1.bf16.msra.mxu0 %v1700_v14  ;;  %1709 = vmatpush1.bf16.msra.mxu1 %v1708_v16  ;;  %v1189_v39 = vmax.f32 %v1126_v13, %v1157_v28  ;;  %v1208_v49 = vrot.slane %v1203_v48, %v1851_v11  ;;  %s1594_s19 = sshll.u32 %s1767_s2, 4  ;;  %s1595_s19 = int_to_ptr.vmem [resolvable:$true] %s1594_s19 }
 0x20a   :  { %v1163_v2 = vmul.f32 0.2, %v1043_v29  ;;  %v1165_v32 = vmul.f32 0.2, %v1132_v30  ;;  %v1513_v56 = vsub.s32 %v1510_v58, %v1832_v3  ;;  %v1555_v26 = vadd.f32 1.0, %v1554_v24  ;;  %s1740_s4 = scalar_lea.vmem %s1595_s19, 128  ;;  %p1745_p1 = scmp.lt.s32.totalorder %s1595_s19, %s1595_s19 }
 0x20b   :  { %v1194_v35 = vmax.f32 %v1041_v22, %v1162_v50  ;;  %v1196_v36 = vmax.f32 %v1130_v37, %v1164_v31  ;;  %v1578_v50 = vmul.u32 128, %v1832_v3  ;;  %v1580_v31 = vand.u32 127, %v106_v1  ;;  %p1741_p0 = scmp.ne.s32.totalorder %s1595_s19, %s1740_s4  ;;  %p1746_p2 = scmp.lt.s32.totalorder %s1740_s4, %s1740_s4 }
 0x20c   :  { %v1195_v41 = vmax.f32 %v1043_v29, %v1163_v2  ;;  %v1197_v42 = vmax.f32 %v1132_v30, %v1165_v32  ;;  %v1556_v29 = vmul.f32 0.5, %v1555_v26 }
 0x20d   :  { %v1704_v43 = vpack.c.bf16 %v1194_v35, %v1186_v33  ;;  %v1712_v44 = vpack.c.bf16 %v1196_v36, %v1188_v34  ;;  %v1581_v35 = vadd.s32 %v1580_v31, %v1578_v50  ;;  %p1747_p3 = por %p1746_p2, %p1745_p1 }
 0x20e   :  { %v1702_v45 = vpack.c.bf16 %v1195_v41, %v1187_v38  ;;  %v1710_v60 = vpack.c.bf16 %v1197_v42, %v1189_v39  ;;  %v1569_v33 = vsub.f32 1.0, %v1556_v29 }
 0x20f   :  { %vm1583_vm3 = vcmp.lt.s32.totalorder %v1581_v35, 512  ;;  %p1748_p4 = pnand %p1747_p3, %p1741_p0 }
 0x210   :  { %1703 = vmatprep.subr.bf16.mxu0 %v1702_v45  ;;  %1711 = vmatprep.subr.bf16.mxu1 %v1710_v60 }
 0x211   :  { %1705 = vmatpush1.bf16.msra.mxu0 %v1704_v43  ;;  %1713 = vmatpush1.bf16.msra.mxu1 %v1712_v44 }
 0x214   :  { %1648 = vmatmul.mubr.msk.f32.vlgmr.msra.gmra.mrb[34].mxu0 %vm765_vm2, %v1198_v57  ;;  %1649 = vmatmul.mubr.msk.f32.vlgmr.msra.gmra.mrb[34].mxu1 %vm765_vm2, %v1198_v57 }
 0x2d6   :  { %v1278_v51 = vpop.f32.mrb[32].mxu0 }
 0x2d7   :  { %v1279_v52 = vadd.f32 %v1278_v51, %v1208_v49  ;;  %v1349_v15 = vpop.f32.mrb[32].mxu1  ;;  %v1280_v53 = vpop.f32.mrb[33].mxu0 }
 0x2d8   :  { %v1350_v54 = vadd.f32 %v1349_v15, %v1208_v49  ;;  %v1281_v55 = vadd.f32 %v1280_v53, %v1208_v49  ;;  %v1351_v59 = vpop.f32.mrb[33].mxu1 }
 0x2d9   :  { %v1352_v61 = vadd.f32 %v1351_v59, %v1208_v49 }
 0x2da   :  { %v1504_v62 = vcombine.low %v1279_v52, %v1281_v55 }
 0x2db   :  { %v1505_v63 = vcombine.low %v1350_v54, %v1352_v61 }
 0x2dc   :  { %v1514_v0 = vrot.slane %v1504_v62, %v1513_v56 }
 0x2dd   :  { %v1521_v57 = vrot.slane %v1505_v63, %v1513_v56 }
 0x2df   :  { %v1536_v4 = vcombine.low %v1514_v0, %v1521_v57 }
 0x2e1   :  { %v1544_v17 = vrot.slane %v1536_v4, %v1513_v56 }
 0x2e7   :  { %v1420_v5 = vpop.f32.mrb[34].mxu0  ;;  %v1491_v25 = vpop.f32.mrb[34].mxu1 }
 0x2e8   :  { %v1421_v23 = vadd.f32 %v1420_v5, %v1208_v49  ;;  %v1492_v6 = vadd.f32 %v1491_v25, %v1208_v49  ;;  %v1422_v11 = vpop.f32.mrb[35].mxu0  ;;  %v1493_v7 = vpop.f32.mrb[35].mxu1 }
 0x2e9   :  { %v1423_v8 = vadd.f32 %v1422_v11, %v1208_v49  ;;  %v1494_v9 = vadd.f32 %v1493_v7, %v1208_v49 }
 0x2eb   :  { %v1506_v10 = vcombine.low %v1421_v23, %v1423_v8  ;;  %v1507_v12 = vcombine.low %v1492_v6, %v1494_v9 }
 0x2ed   :  { %v1528_v13 = vrot.slane %v1506_v10, %v1513_v56  ;;  %v1535_v14 = vrot.slane %v1507_v12, %v1513_v56 }
 0x2ef   :  { %v1537_v16 = vcombine.low %v1528_v13, %v1535_v14 }
 0x2f1   :  { %v1551_v18 = vrot.slane %v1537_v16, %v1513_v56 }
 0x2f3   :  { %v1552_v19 = vcombine.low %v1544_v17, %v1551_v18 }
 0x2f5   :  { %v1557_v40 = vand.u32 2147483647, %v1552_v19  ;;  %v1564_v28 = vmax.f32 %v1552_v19, 0.0 }
 0x2f7   :  { %v1558_v20 = vsub.f32 0.0, %v1557_v40 }
 0x2f9   :  { %v1559_v21 = vmul.f32 1.442695, %v1558_v20 }
 0x2fb   :  { %1736 = vpow2.f32 %v1559_v21 }
 0x305   :  { %v1737_v22 = vpop.eup %1736 }
 0x306   :  { %v1561_v37 = vadd.f32 1.0, %v1737_v22 }
 0x308   :  { %1738 = vlog2.f32 %v1561_v37 }
 0x312   :  { %v1739_v27 = vpop.eup %1738 }
 0x313   :  { %v1563_v30 = vmul.f32 0.6931472, %v1739_v27 }
 0x315   :  { %v1565_v2 = vadd.f32 %v1564_v28, %v1563_v30 }
 0x317   :  { %v1566_v32 = vsub.f32 %v1565_v2, %v1552_v19  ;;  %v1570_v34 = vmin.f32 %v1565_v2, 100.0 }
 0x319   :  { %v1567_v36 = vmin.f32 %v1566_v32, 100.0  ;;  %v1571_v39 = vmul.f32 %v1570_v34, %v1569_v33 }
 0x31b   :  { %v1568_v38 = vmul.f32 %v1567_v36, %v1556_v29 }
 0x31d   :  { %v1572_v41 = vadd.f32 %v1571_v39, %v1568_v38 }
 0x31f   :  { %v1584_v42 = vsel %vm1583_vm3, %v1572_v41, 0.0 }
 0x320   :  { %1587 = vst [vmem:[#allocation4] sm:$0xff] %v1584_v42 }
 0x321   :  { %1751 = shalt.err (!%p1748_p4)
}
 0x322   :  { %s1752_s22 = scalar_lea.hbm %s2113_s9, 128 }
 0x323   :  { %p1753_p5 = scmp.ne.s32.totalorder %s2113_s9, %s1752_s22  ;;  %p1756_p6 = scmp.lt.u32.totalorder %s1752_s22, %s2113_s9 }
 0x325   :  { %p1758_p7 = pnand %p1756_p6, %p1753_p5 }
 0x327   :  { %1761 = shalt.err (!%p1758_p7)
}
 0x328   :  { %1597 = dma.vmem_to_hbm [thread:$0]  %s1595_s19, 128, %s2113_s9, [#allocation5]  }
 0x329   :  { %1762 = dma.done.wait [#allocation5], 128  }
 0x32a   :  { %1763 = vsyncadd [#allocation5], 4294967168 }
 0x32b   :  { %1601 = vsyncpa [#allocation5], 1 }

</bundles_post_ra>
